<compile_context>
chip_gen: v5e
topology: v5e:2x2
jax: 0.10.0
libtpu: 0.0.40
codegen_flags: <defaults>
</compile_context>

<pallas_src>
import functools

import jax
import jax.numpy as jnp
from jax.experimental import pallas as pl
from jax.experimental.pallas import tpu as pltpu

_LANE = 128
_SUBLANE = 8


def _round_up(x, m):
    return (x + m - 1) // m * m


def _gap_reduce_kernel(x_ref, o_ref, acc_ref, *, inv_hw, hw, thw, masked):
    """Accumulate row sums of a (TR, THW) tile; finalize mean on the last hw step."""
    k = pl.program_id(1)

    @pl.when(k == 0)
    def _init():
        acc_ref[...] = jnp.zeros_like(acc_ref)

    x = x_ref[...]
    if masked:
        # Last hw tile may extend past the true spatial extent; zero the
        # out-of-bounds lanes so garbage never reaches the sum.
        lane = jax.lax.broadcasted_iota(jnp.int32, x.shape, 1)
        x = jnp.where(k * thw + lane < hw, x, jnp.zeros_like(x))

    # f32 accumulation of the lane reduction (no full-tile f32 copy).
    acc_ref[...] += jnp.sum(x, axis=-1, keepdims=True, dtype=jnp.float32)

    @pl.when(k == pl.num_programs(1) - 1)
    def _finalize():
        o_ref[...] = (acc_ref[...] * inv_hw).astype(o_ref.dtype)


def _gap_single_kernel(x_ref, o_ref, *, inv_hw):
    """hw fits in one block: reduce and store directly (no scratch, no phases)."""
    s = jnp.sum(x_ref[...], axis=-1, keepdims=True, dtype=jnp.float32)
    o_ref[...] = (s * inv_hw).astype(o_ref.dtype)


def _choose_tiles(rows, hw, itemsize, budget_bytes):
    """Pick (row_tile, hw_tile, masked) with padded-footprint budgeting.

    Footprint of a (tr, thw) VMEM block is round_up(tr, subl) *
    round_up(thw, 128) * itemsize, where subl is the dtype-aware sublane
    packing multiple (8 for 32-bit, 16 for 16-bit, 32 for 8-bit).
    """
    subl = _SUBLANE * max(1, 4 // max(1, itemsize))

    def row_pad(n):
        return _round_up(n, subl)

    def lane_pad(n):
        return _round_up(n, _LANE)

    tr_min = rows if rows <= subl else subl

    # Case A: the full spatial extent fits in one block with a minimal row tile.
    if row_pad(tr_min) * lane_pad(hw) * itemsize <= budget_bytes:
        thw = hw
        if rows <= subl:
            tr = rows  # full extent -> no (8, .) divisibility requirement
        else:
            tr = (budget_bytes // (lane_pad(hw) * itemsize)) // subl * subl
            tr = max(subl, min(tr, (rows // subl) * subl))
        return tr, thw, False

    # Case B: split the hw (reduction) axis into multiple-of-128 tiles.
    lanes_budget = budget_bytes // (row_pad(tr_min) * itemsize * _LANE)
    lanes_budget = max(1, min(lanes_budget, pl.cdiv(hw, _LANE)))

    thw = None
    masked = False
    if hw % _LANE == 0:
        # Prefer an exact divisor of hw (no masking needed).
        for k in range(lanes_budget, 0, -1):
            if hw % (k * _LANE) == 0:
                thw = k * _LANE
                break
    if thw is None:
        # hw not a multiple of 128 (or no divisor fits): non-dividing tile,
        # mask the partial last tile in the kernel.
        thw = lanes_budget * _LANE
        masked = (hw % thw) != 0

    if rows <= subl:
        tr = rows
    else:
        tr = (budget_bytes // (thw * itemsize)) // subl * subl
        tr = max(subl, min(tr, (rows // subl) * subl))
    return tr, thw, masked


def global_avg_pool2d(x, *, block_bytes=8 * 1024 * 1024,
                      vmem_limit_bytes=48 * 1024 * 1024):
    """x: (N, C, H, W) -> (N, C, 1, 1), mean over H and W (== F.avg_pool2d)."""
    N, C, H, W = x.shape
    rows, hw = N * C, H * W
    x2d = x.reshape(rows, hw)
    itemsize = x2d.dtype.itemsize

    # Keep the double-buffered input blocks (2x) + tiny out/scratch comfortably
    # under the scoped VMEM limit.
    budget = min(block_bytes, max(512 * 1024, vmem_limit_bytes // 2 - (1 << 20)))
    tr, thw, masked = _choose_tiles(rows, hw, itemsize, budget)

    row_tiles = pl.cdiv(rows, tr)
    hw_tiles = pl.cdiv(hw, thw)

    cost = pl.CostEstimate(
        flops=rows * hw,                       # one add per element (+ the divide)
        transcendentals=0,
        bytes_accessed=rows * hw * itemsize + rows * itemsize,
    )
    compiler_params_2d = pltpu.CompilerParams(
        # Row tiles are independent -> "parallel" (megacore sharding on v7x);
        # hw is a sequential reduction -> "arbitrary" (innermost).
        dimension_semantics=("parallel", "arbitrary"),
        vmem_limit_bytes=vmem_limit_bytes,
    )
    compiler_params_1d = pltpu.CompilerParams(
        dimension_semantics=("parallel",),
        vmem_limit_bytes=vmem_limit_bytes,
    )

    if hw_tiles == 1:
        # Common case: whole spatial extent per block; no accumulator needed.
        out2d = pl.pallas_call(
            functools.partial(_gap_single_kernel, inv_hw=1.0 / hw),
            out_shape=jax.ShapeDtypeStruct((rows, 1), x.dtype),
            grid_spec=pltpu.PrefetchScalarGridSpec(
                num_scalar_prefetch=0,
                grid=(row_tiles,),
                in_specs=[pl.BlockSpec((tr, hw), lambda i: (i, 0))],
                out_specs=pl.BlockSpec((tr, 1), lambda i: (i, 0)),
            ),
            compiler_params=compiler_params_1d,
            cost_estimate=cost,
        )(x2d)
    else:
        out2d = pl.pallas_call(
            functools.partial(_gap_reduce_kernel, inv_hw=1.0 / hw,
                              hw=hw, thw=thw, masked=masked),
            out_shape=jax.ShapeDtypeStruct((rows, 1), x.dtype),
            grid_spec=pltpu.PrefetchScalarGridSpec(
                num_scalar_prefetch=0,
                grid=(row_tiles, hw_tiles),
                in_specs=[pl.BlockSpec((tr, thw), lambda i, k: (i, k))],
                # Same output block across the hw (reduction) axis -> resident.
                out_specs=pl.BlockSpec((tr, 1), lambda i, k: (i, 0)),
                scratch_shapes=[pltpu.VMEM((tr, 1), jnp.float32)],
            ),
            compiler_params=compiler_params_2d,
            cost_estimate=cost,
        )(x2d)

    return out2d.reshape(N, C, 1, 1)


if __name__ == "__main__":
    key = jax.random.PRNGKey(0)
    key_a, key_b, key_c = jax.random.split(key, 3)

    # Small example consistent with the module: (N, C, H, W) = (2, 4, 16, 16).
    x = jax.random.normal(key_a, (2, 4, 16, 16), dtype=jnp.float32)
    out = jax.block_until_ready(global_avg_pool2d(x))
    ref = jnp.mean(x, axis=(2, 3), keepdims=True)
    assert out.shape == (2, 4, 1, 1), out.shape
    assert jnp.allclose(out, ref, atol=1e-5, rtol=1e-5)

    # Exercise the split-hw accumulator path (2x2 grid with init/finalize) by
    # forcing a tiny block budget.
    x2 = jax.random.normal(key_b, (2, 8, 16, 16), dtype=jnp.float32)
    out2 = jax.block_until_ready(global_avg_pool2d(x2, block_bytes=4096))
    ref2 = jnp.mean(x2, axis=(2, 3), keepdims=True)
    assert out2.shape == (2, 8, 1, 1), out2.shape
    assert jnp.allclose(out2, ref2, atol=1e-5, rtol=1e-5)

    # Exercise the masked (hw not a multiple of 128, non-dividing tile) path.
    x3 = jax.random.normal(key_c, (1, 2, 10, 30), dtype=jnp.float32)
    out3 = jax.block_until_ready(global_avg_pool2d(x3, block_bytes=2048))
    ref3 = jnp.mean(x3, axis=(2, 3), keepdims=True)
    assert out3.shape == (1, 2, 1, 1), out3.shape
    assert jnp.allclose(out3, ref3, atol=1e-5, rtol=1e-5)

    print("KERNEL_OK")
</pallas_src>

<mosaic_0001>
module attributes {stable_mosaic.version = 11 : i64} {
  func.func @_gap_single_kernel(%arg0: i32, %arg1: memref<8x256xf32, #tpu.memory_space<vmem>>, %arg2: memref<8x1xf32, #tpu.memory_space<vmem>>) attributes {dimension_semantics = [#tpu.dimension_semantics<parallel>], iteration_bounds = array<i64: 1>, scalar_prefetch = 0 : i64, scratch_operands = 0 : i64, tpu.core_type = #tpu.core_type<tc>, window_params = [{transform_indices = @transform_0, window_bounds = array<i64: 8, 256>}, {transform_indices = @transform_1, window_bounds = array<i64: 8, 1>}]} {
    %c0 = arith.constant 0 : index
    %c0_0 = arith.constant 0 : index
    %0 = vector.load %arg1[%c0, %c0_0] : memref<8x256xf32, #tpu.memory_space<vmem>>, vector<8x256xf32>
    %cst = arith.constant dense<0.000000e+00> : vector<8xf32>
    %1 = vector.multi_reduction <add>, %0, %cst [1] : vector<8x256xf32> to vector<8xf32>
    %2 = vector.shape_cast %1 : vector<8xf32> to vector<8x1xf32>
    %cst_1 = arith.constant 3.906250e-03 : f32
    %3 = vector.broadcast %cst_1 : f32 to vector<8x1xf32>
    %4 = arith.mulf %2, %3 : vector<8x1xf32>
    %c0_2 = arith.constant 0 : index
    %c0_3 = arith.constant 0 : index
    %5 = vector.load %arg2[%c0_2, %c0_3] : memref<8x1xf32, #tpu.memory_space<vmem>>, vector<8x1xf32>
    tpu.vector_store %arg2[%c0_2, %c0_3], %4 {strides = array<i32>} : memref<8x1xf32, #tpu.memory_space<vmem>>, vector<8x1xf32>,
    return
  }
  func.func @transform_0(%arg0: i32) -> (i32, i32) {
    %c0_i32 = arith.constant 0 : i32
    %c0_i32_0 = arith.constant 0 : i32
    return %arg0, %c0_i32 : i32, i32
  }
  func.func @transform_1(%arg0: i32) -> (i32, i32) {
    %c0_i32 = arith.constant 0 : i32
    %c0_i32_0 = arith.constant 0 : i32
    return %arg0, %c0_i32 : i32, i32
  }
}

</mosaic_0001>

<bundles_post_ra>
// kernel: tpu_custom_call.1
= control target key start
LH: loop header
LB: loop body
LE: loop exit
PB: predicated region body
PF: predicated region fallthrough
CT: control target
= control target key end

     0   :  { %6 = vsyncpa [#allocation3], 0  ;;  %s62_s9 = smov [#allocation2]   ;;  %s79_s0 = inlined_call_operand.hbm [shape: f32[8,256], index: 0, kind: input, shape index: {}]   ;;  %s80_s1 = inlined_call_operand.vmem [shape: f32[8,1], index: 1, kind: output, shape index: {}]  }
   0x1   :  { %s12_s8 = sshll.u32 %s79_s0, 4  ;;  %s14_s10 = sshll.u32 %s62_s9, 4  ;;  %s13_s8 = int_to_ptr.hbm [resolvable:$true] %s12_s8  ;;  %s15_s10 = int_to_ptr.vmem [resolvable:$true] %s14_s10 }
   0x2   :  { %17 = dma.hbm_to_vmem [thread:$0]  %s13_s8, 256, %s15_s10, [#allocation3]  }
   0x3   :  { %60 = dma.done.wait [#allocation3], 256  }
   0x4   :  { %61 = vsyncadd [#allocation3], 4294967040  ;;  %v22_v0 = vld [vmem:[#allocation2] sm:$0xff]  ;;  %v23_v1 = vld [vmem:[#allocation2 + $0x8] sm:$0xff]  ;;  %vm28_vm0 = vcmask 7168  }
   0x5   :  { %v24_v2 = vadd.f32 %v23_v1, %v22_v0 }
   0x7   :  { %25 = vadd.xlane.f32.xlu0 %v24_v2 }
  0x7a   :  { %v26_v3 = vpop.xlane.xlu0 %25 }
  0x7b   :  { %v27_v4 = vmul.f32 0.00390625, %v26_v3 }
  0x7d   :  { %29 = vst.msk [vmem:[%s80_s1] sm:$0xff] %vm28_vm0, %v27_v4 }
  0x7e   :  { %34 = vsyncpa [#allocation3], 1 }

</bundles_post_ra>
